<compile_context>
chip_gen: v7x
topology: tpu7x:2x2x1
jax: 0.10.0
libtpu: 0.0.40
codegen_flags: <defaults>
</compile_context>

<pallas_src>
import jax
import jax.numpy as jnp
from jax.experimental import pallas as pl
from jax.experimental.pallas import tpu as pltpu


def gelayer_kernel(x_ref, w_ref, s_ref, o_ref):
    # x_ref: (TB, TC, HW)  native NCHW block: channels on sublanes, HW on lanes
    # w_ref: (TC, HW)      folded depthwise weights (f32)
    # s_ref: (TC, 1)       folded conv-bias / BN shift (f32)
    # o_ref: (TB, TC, HW)
    #
    # Depthwise full-extent conv == per-channel weighted sum over HW (lanes).
    # Fused upcast * weight * reduce: no full-block f32 temporary is bound.
    logits = jnp.sum(x_ref[...].astype(jnp.float32) * w_ref[...],
                     axis=-1, keepdims=True)                    # (TB, TC, 1) f32
    gate = jax.nn.sigmoid(logits + s_ref[...])                  # (TB, TC, 1) f32
    # Gating multiply in the input dtype (bf16 stays bf16 on v6e/v7x); only
    # the tiny gate is cast.  x_ref is re-read from VMEM (cheap vld).
    o_ref[...] = x_ref[...] * gate.astype(o_ref.dtype)


def _vmem_limit_bytes():
    # ~3/4 of physical VMEM: 96 MiB on v5e/v6e (128 MiB), 48 MiB on v7x (64 MiB).
    try:
        cap = pltpu.get_tpu_info().vmem_capacity_bytes
    except Exception:
        cap = 64 << 20          # conservative fallback (v7x-sized)
    return int(cap * 3 // 4)


def gelayer_forward(x_nchw, conv_w, conv_b, gamma, beta, run_mean, run_var,
                    eps=1e-5, *, target_block_bytes=4 * 1024 * 1024,
                    alias_input=False):
    """x_nchw: (B, C, H, W) NCHW activations (f32 or bf16).  Returns same shape/dtype."""
    B, C, H, W = x_nchw.shape
    kh, kw = conv_w.shape[-2], conv_w.shape[-1]
    # Guard: the global-sum shortcut is only valid when the depthwise kernel
    # covers the full spatial extent (stride 1, no padding) -> 1x1 conv output.
    assert (kh, kw) == (H, W), (
        "GELayer Pallas kernel requires conv kernel size == input spatial size")
    HW = H * W

    # NCHW stays NCHW: (B, C, HW) is a free reshape of the contiguous input
    # (no HBM relayout pass; the kernel is exactly 1 read + 1 write of x).
    x2 = x_nchw.reshape(B, C, HW)

    # Fold eval-mode BatchNorm affine + conv bias into weights / shift (f32).
    inv_std = jax.lax.rsqrt(run_var.astype(jnp.float32) + eps)
    scale = gamma.astype(jnp.float32) * inv_std                       # (C,)
    w2 = conv_w.reshape(C, HW).astype(jnp.float32) * scale[:, None]   # (C, HW)
    s2 = (beta.astype(jnp.float32)
          - run_mean.astype(jnp.float32) * scale
          + conv_b.astype(jnp.float32) * scale).reshape(C, 1)         # (C, 1)

    itemsize = jnp.dtype(x_nchw.dtype).itemsize
    row_bytes = HW * itemsize                       # one channel of one image

    # Channel tile: full C unless a single image exceeds the block target
    # (keeps per-block VMEM bounded on v7x's 64 MiB).  Channels are
    # independent, so no accumulator / "arbitrary" axis is needed.
    if C * row_bytes <= target_block_bytes or C <= 8:
        tc = C
    else:
        tc = min(C, max(8, (target_block_bytes // row_bytes) // 8 * 8))
    grid_c = pl.cdiv(C, tc)

    # Batch tile: as many images as fit in the target, preferring a tb that
    # divides B (balanced blocks -> even split across v7x's two TensorCores),
    # and keeping >= 2 grid steps whenever B allows.
    tb_cap = min(B, max(1, target_block_bytes // max(1, tc * row_bytes)))
    tb = 1
    for cand in range(tb_cap, 0, -1):
        if B % cand == 0:
            tb = cand
            break
    if B >= 2 and grid_c == 1 and tb == B:
        for cand in range(B // 2, 0, -1):
            if B % cand == 0:
                tb = cand
                break
    grid_b = pl.cdiv(B, tb)

    out = pl.pallas_call(
        gelayer_kernel,
        out_shape=jax.ShapeDtypeStruct((B, C, HW), x_nchw.dtype),
        grid_spec=pltpu.PrefetchScalarGridSpec(
            num_scalar_prefetch=0,
            grid=(grid_b, grid_c),
            in_specs=[
                pl.BlockSpec((tb, tc, HW), lambda b, c: (b, c, 0)),  # x (NCHW)
                pl.BlockSpec((tc, HW), lambda b, c: (c, 0)),         # folded w
                pl.BlockSpec((tc, 1), lambda b, c: (c, 0)),          # folded shift
            ],
            out_specs=pl.BlockSpec((tb, tc, HW), lambda b, c: (b, c, 0)),
        ),
        compiler_params=pltpu.CompilerParams(
            dimension_semantics=("parallel", "parallel"),
            vmem_limit_bytes=_vmem_limit_bytes()),
        # Reuse x's HBM buffer for the output when the caller no longer needs
        # x after this layer (halves peak activation footprint; no BW change).
        input_output_aliases=({0: 0} if alias_input else {}),
    )(x2, w2, s2)

    return out.reshape(B, C, H, W)


def gelayer_ref(x, conv_w, conv_b, gamma, beta, rm, rv, eps=1e-5):
    # Pure-JAX reference of the same math (eval-mode BN), computed in f32.
    C = x.shape[1]
    xf = x.astype(jnp.float32)
    w = conv_w.reshape(C, *conv_w.shape[-2:]).astype(jnp.float32)
    gate = jnp.einsum('bchw,chw->bc', xf, w) + conv_b
    gate = (gate - rm) / jnp.sqrt(rv + eps) * gamma + beta
    gate = jax.nn.sigmoid(gate)[:, :, None, None]
    return xf * gate


if __name__ == "__main__":
    # layer_idx = 4 -> kernel_size = 7, so input spatial must be 7x7.
    B, C, K = 4, 8, 7

    key = jax.random.PRNGKey(0)
    kx, kw, kb, kg, kbe, km, kv = jax.random.split(key, 7)

    x = jax.random.normal(kx, (B, C, K, K), dtype=jnp.float32)
    # Conv2d(C, C, K, groups=C) weight shape: (C, 1, K, K), bias: (C,)
    conv_w = jax.random.normal(kw, (C, 1, K, K), dtype=jnp.float32) * 0.1
    conv_b = jax.random.normal(kb, (C,), dtype=jnp.float32) * 0.1
    # BatchNorm2d params / running stats (eval mode).
    gamma = 1.0 + 0.1 * jax.random.normal(kg, (C,), dtype=jnp.float32)
    beta = 0.1 * jax.random.normal(kbe, (C,), dtype=jnp.float32)
    run_mean = 0.1 * jax.random.normal(km, (C,), dtype=jnp.float32)
    run_var = 1.0 + 0.1 * jax.random.uniform(kv, (C,), dtype=jnp.float32)

    ref = gelayer_ref(x, conv_w, conv_b, gamma, beta, run_mean, run_var)

    # 1) f32 path (batch-tiled grid, no channel tiling).
    out = jax.block_until_ready(
        gelayer_forward(x, conv_w, conv_b, gamma, beta, run_mean, run_var))
    assert out.shape == x.shape and out.dtype == x.dtype
    assert jnp.allclose(out, ref, atol=1e-5, rtol=1e-5)

    # 2) bf16 activations (memory-bound op: half the HBM bytes); the reduction
    #    and the gate still accumulate / evaluate in f32 inside the kernel.
    out_bf16 = jax.block_until_ready(
        gelayer_forward(x.astype(jnp.bfloat16), conv_w, conv_b, gamma, beta,
                        run_mean, run_var))
    assert out_bf16.dtype == jnp.bfloat16
    assert jnp.allclose(out_bf16.astype(jnp.float32), ref, atol=5e-2, rtol=5e-2)

    # 3) Force the channel-tiled path (v7x large-block guard): tiny block
    #    target -> tc=8, (2, 2) grid.
    B2, C2 = 2, 16
    x2 = jax.random.normal(kx, (B2, C2, K, K), dtype=jnp.float32)
    cw2 = jax.random.normal(kw, (C2, 1, K, K), dtype=jnp.float32) * 0.1
    cb2 = jnp.zeros((C2,), jnp.float32)
    g2 = jnp.ones((C2,), jnp.float32)
    be2 = jnp.zeros((C2,), jnp.float32)
    rm2 = jnp.zeros((C2,), jnp.float32)
    rv2 = jnp.ones((C2,), jnp.float32)
    ref2 = gelayer_ref(x2, cw2, cb2, g2, be2, rm2, rv2)
    out2 = jax.block_until_ready(
        gelayer_forward(x2, cw2, cb2, g2, be2, rm2, rv2,
                        target_block_bytes=1024))
    assert jnp.allclose(out2, ref2, atol=1e-5, rtol=1e-5)

    print("KERNEL_OK")
</pallas_src>

<mosaic_0001>
module attributes {stable_mosaic.version = 11 : i64} {
  func.func @gelayer_kernel(%arg0: i32, %arg1: i32, %arg2: memref<2x8x49xf32, #tpu.memory_space<vmem>>, %arg3: memref<8x49xf32, #tpu.memory_space<vmem>>, %arg4: memref<8x1xf32, #tpu.memory_space<vmem>>, %arg5: memref<2x8x49xf32, #tpu.memory_space<vmem>>) attributes {dimension_semantics = [#tpu.dimension_semantics<parallel>, #tpu.dimension_semantics<parallel>], iteration_bounds = array<i64: 2, 1>, scalar_prefetch = 0 : i64, scratch_operands = 0 : i64, tpu.core_type = #tpu.core_type<tc>, window_params = [{transform_indices = @transform_0, window_bounds = array<i64: 2, 8, 49>}, {transform_indices = @transform_1, window_bounds = array<i64: 8, 49>}, {transform_indices = @transform_2, window_bounds = array<i64: 8, 1>}, {transform_indices = @transform_3, window_bounds = array<i64: 2, 8, 49>}]} {
    %c0 = arith.constant 0 : index
    %c0_0 = arith.constant 0 : index
    %c0_1 = arith.constant 0 : index
    %0 = vector.load %arg2[%c0, %c0_0, %c0_1] : memref<2x8x49xf32, #tpu.memory_space<vmem>>, vector<2x8x49xf32>
    %c0_2 = arith.constant 0 : index
    %c0_3 = arith.constant 0 : index
    %1 = vector.load %arg3[%c0_2, %c0_3] : memref<8x49xf32, #tpu.memory_space<vmem>>, vector<8x49xf32>
    %2 = vector.shape_cast %1 : vector<8x49xf32> to vector<1x8x49xf32>
    %3 = vector.broadcast %2 : vector<1x8x49xf32> to vector<2x8x49xf32>
    %4 = arith.mulf %0, %3 : vector<2x8x49xf32>
    %cst = arith.constant dense<0.000000e+00> : vector<2x8xf32>
    %5 = vector.multi_reduction <add>, %4, %cst [2] : vector<2x8x49xf32> to vector<2x8xf32>
    %6 = vector.shape_cast %5 : vector<2x8xf32> to vector<2x8x1xf32>
    %c0_4 = arith.constant 0 : index
    %c0_5 = arith.constant 0 : index
    %7 = vector.load %arg4[%c0_4, %c0_5] : memref<8x1xf32, #tpu.memory_space<vmem>>, vector<8x1xf32>
    %8 = vector.shape_cast %7 : vector<8x1xf32> to vector<1x8x1xf32>
    %9 = vector.broadcast %8 : vector<1x8x1xf32> to vector<2x8x1xf32>
    %10 = arith.addf %6, %9 : vector<2x8x1xf32>
    %11 = arith.negf %10 : vector<2x8x1xf32>
    %12 = math.exp %11 : vector<2x8x1xf32>
    %cst_6 = arith.constant 1.000000e+00 : f32
    %13 = vector.broadcast %cst_6 : f32 to vector<2x8x1xf32>
    %14 = arith.addf %13, %12 : vector<2x8x1xf32>
    %15 = arith.divf %13, %14 : vector<2x8x1xf32>
    %c0_7 = arith.constant 0 : index
    %c0_8 = arith.constant 0 : index
    %c0_9 = arith.constant 0 : index
    %16 = vector.load %arg2[%c0_7, %c0_8, %c0_9] : memref<2x8x49xf32, #tpu.memory_space<vmem>>, vector<2x8x49xf32>
    %17 = vector.broadcast %15 : vector<2x8x1xf32> to vector<2x8x49xf32>
    %18 = arith.mulf %16, %17 : vector<2x8x49xf32>
    %c0_10 = arith.constant 0 : index
    %c0_11 = arith.constant 0 : index
    %c0_12 = arith.constant 0 : index
    %19 = vector.load %arg5[%c0_10, %c0_11, %c0_12] : memref<2x8x49xf32, #tpu.memory_space<vmem>>, vector<2x8x49xf32>
    tpu.vector_store %arg5[%c0_10, %c0_11, %c0_12], %18 {strides = array<i32>} : memref<2x8x49xf32, #tpu.memory_space<vmem>>, vector<2x8x49xf32>,
    return
  }
  func.func @transform_0(%arg0: i32, %arg1: i32) -> (i32, i32, i32) {
    %c0_i32 = arith.constant 0 : i32
    %c0_i32_0 = arith.constant 0 : i32
    return %arg0, %arg1, %c0_i32 : i32, i32, i32
  }
  func.func @transform_1(%arg0: i32, %arg1: i32) -> (i32, i32) {
    %c0_i32 = arith.constant 0 : i32
    %c0_i32_0 = arith.constant 0 : i32
    return %arg1, %c0_i32 : i32, i32
  }
  func.func @transform_2(%arg0: i32, %arg1: i32) -> (i32, i32) {
    %c0_i32 = arith.constant 0 : i32
    %c0_i32_0 = arith.constant 0 : i32
    return %arg1, %c0_i32 : i32, i32
  }
  func.func @transform_3(%arg0: i32, %arg1: i32) -> (i32, i32, i32) {
    %c0_i32 = arith.constant 0 : i32
    %c0_i32_0 = arith.constant 0 : i32
    return %arg0, %arg1, %c0_i32 : i32, i32, i32
  }
}

</mosaic_0001>

<bundles_post_ra>
// kernel: tpu_custom_call.1
= control target key start
LH: loop header
LB: loop body
LE: loop exit
PB: predicated region body
PF: predicated region fallthrough
CT: control target
= control target key end

     0   :  { %8 = vsyncpa [#allocation3], 0  ;;  %s841_s0 = inlined_call_operand.hbm [shape: f32[4,8,49], index: 0, kind: input, shape index: {}]   ;;  %s842_s1 = inlined_call_operand.vmem [shape: f32[8,49], index: 1, kind: input, shape index: {}]   ;;  %s843_s2 = inlined_call_operand.vmem [shape: f32[8,1], index: 2, kind: input, shape index: {}]   ;;  %s844_s3 = inlined_call_operand.hbm [shape: f32[4,8,49], index: 3, kind: output, shape index: {}]  }
   0x1   :  { %10 = vsyncpa [#allocation3 + $0x1], 0 }
   0x2   :  { %11 = vsyncpa [#allocation4], 0 }
   0x3   :  { %13 = vsyncpa [#allocation4 + $0x1], 0  ;;  %s652_s12 = smov 0   ;;  %s654_s13 = smov 0  }
   0x4   :  { %s656_s14 = smov 0   ;;  %s658_s15 = smov 0  }
   0x5   :  { %s660_s16 = smov 0   ;;  %s662_s17 = smov 0  }
   0x6 LB: > { %s413_s18 = sadd.s32 4294967295, %s623_s17   ;;  %s414_s19 = sadd.s32 4294967294, %s623_s17   ;;  %s623_s17 = sphi %s662_s17, %s19_s17   ;;  %s619_s16 = sphi %s660_s16, %s859_s16   ;;  %s615_s15 = sphi %s658_s15, %s858_s15   ;;  %s611_s14 = sphi %s656_s14, %s857_s14   ;;  %s607_s13 = sphi %s654_s13, %s856_s13   ;;  %s603_s12 = sphi %s652_s12, %s855_s12  }
   0x7   : > { %s31_s20 = sadd.s32 1, %s619_s16  ;;  %s40_s21 = sadd.s32 1, %s611_s14 }
   0x8   : > { %p33_p0 = scmp.ge.s32.totalorder %s31_s20, 2  ;;  %p47_p1 = scmp.ne.s32.totalorder %s611_s14, %s607_s13 }
   0x9   : > { %p48_p2 = scmp.eq.s32.totalorder %s623_s17, 0  ;;  %p53_p3 = scmp.ne.s32.totalorder %s607_s13, %s603_s12 }
   0xa   : > { %s861_s20 = smov (%p33_p0, %s31_s20), 0  ;;  %p54_p5 = scmp.eq.s32.totalorder %s413_s18, 0 }
   0xb   : > { %p693_p4 = por %p48_p2, %p47_p1  ;;  %s35_s23 = ssub.s32 %s619_s16, %s861_s20 }
   0xc   : > { %p131_p6 = scmp.eq.s32.totalorder %s413_s18, 1  ;;  %p38_p7 = scmp.eq.s32.totalorder %s35_s23, 0 }
   0xd   : > { %p699_p8 = por %p54_p5, %p53_p3  ;;  %p137_p10 = scmp.eq.s32.totalorder %s414_s19, 1 }
   0xe   : > { %p703_p9 = por %p131_p6, %p47_p1  ;;  %p446_p13 = scmp.lt.s32.totalorder %s623_s17, 2 }
   0xf   : > { %s708_s26 = scalar_select %p38_p7, %s611_s14, %s40_s21  }
  0x10   : > { %s848_s25 = scalar_select %p703_p9, 1, 0 }
  0x11   : > { %p710_p11 = por %p137_p10, %p53_p3  ;;  %s171_s28 = sand.u32 1, %s611_s14  }
  0x12   : > { %s419_s29 = sshll.u32 %s171_s28, 4  ;;  %s432_s30 = sshll.u32 %s619_s16, 8 }
  0x13   : > { %s849_s27 = scalar_select %p710_p11, 1, 0 }
  0x14   : > { %s721_s6 = scalar_lea.hbm %s841_s0, %s432_s30  ;;  %s175_s7 = scalar_lea.vmem [#allocation2], %s419_s29 }
  0x15   : > { %s183_s8 = sshll.u32 %s175_s7, 4  ;;  %p727_p0 = pnand %p446_p13, %p693_p4  ;;  %s723_s8 = int_to_ptr.vmem [resolvable:$true] %s183_s8 }
  0x16   : > { %s732_s10 = scalar_lea.sflag [#allocation3], %s171_s28  ;;  %s511_s11 = scalar_lea.hbm %s721_s6, 256 }
  0x17   : > { %p512_p2 = scmp.ne.s32.totalorder %s721_s6, %s511_s11  ;;  %p513_p3 = pneg %p727_p0 }
  0x18   : > { %s516_s21 = scalar_lea.hbm %s841_s0, 512  ;;  %p517_p4 = scmp.lt.u32.totalorder %s721_s6, %s841_s0 }
  0x19   : > { %p514_p5 = pnand %p513_p3, %p512_p2  ;;  %p518_p7 = scmp.lt.u32.totalorder %s516_s21, %s511_s11 }
  0x1a   : > { %p520_p13 = scmp.lt.u32.totalorder %s511_s11, %s721_s6 }
  0x1b   : > { %p515_p6 = pneg %p514_p5  ;;  %p519_p10 = por %p518_p7, %p517_p4 }
  0x1d   : > { %p521_p12 = por %p520_p13, %p519_p10 }
  0x1f   : > { %p522_p1 = pnand %p521_p12, %p515_p6 }
  0x21   : > { %525 = shalt.err (!%p522_p1)
}
  0x22   : > { %s526_s28 = scalar_lea.vmem %s723_s8, 256  ;;  %s625_s29 = smov [#allocation2]  }
  0x23   : > { %p527_p2 = scmp.ne.s32.totalorder %s723_s8, %s526_s28  ;;  %s531_s30 = sshll.u32 %s625_s29, 4  ;;  %s532_s30 = int_to_ptr.vmem [resolvable:$false] %s531_s30 }
  0x24   : > { %s533_s4 = scalar_lea.vmem %s532_s30, 512  ;;  %p534_p9 = scmp.lt.s32.totalorder %s723_s8, %s532_s30 }
  0x25   : > { %p529_p5 = pnand %p527_p2, %p513_p3  ;;  %p535_p4 = scmp.lt.s32.totalorder %s533_s4, %s526_s28 }
  0x27   : > { %p530_p11 = pneg %p529_p5  ;;  %p536_p7 = por %p535_p4, %p534_p9 }
  0x29   : > { %p537_p10 = pnand %p536_p7, %p530_p11 }
  0x2b   : > { %540 = shalt.err (!%p537_p10)
}
  0x2c   : > { %s626_s5 = smov 128   ;;  %s627_s7 = smov 8  }
  0x2d   : > { %441 = dma.hbm_to_vmem [thread:$0]  (!%p727_p0), %s721_s6, 256, %s723_s8, %s732_s10, %s626_s5, %s626_s5, %s627_s7  }
  0x2e   : > { %p191_p12 = scmp.lt.s32.totalorder %s623_s17, 3  ;;  %p851_p1 = scmp.ge.s32.totalorder %s623_s17, 1 }
  0x30   : > { %p192_p3 = pnand %p851_p1, %p191_p12 }
  0x31   : > { %s764_s11 = sand.u32 (!%p192_p3), 1, %s607_s13  }
  0x32   : > { %195 = sbr.rel (%p192_p3) target bundleno = 382 (0x17e), region = 32  ;;  %s423_s18 = sshll.u32 (!%p192_p3), %s764_s11, 4 }
  0x33   : > { %s198_s19 = scalar_lea.sflag (!%p192_p3), [#allocation3], %s764_s11  ;;  %s201_s21 = scalar_lea.vmem (!%p192_p3), [#allocation2], %s423_s18 }
  0x39   : > { %594 = dma.done.wait (%p699_p8), %s198_s19, 256  }
  0x3a   : > { %596 = vsyncadd (%p699_p8), %s198_s19, 4294967040  ;;  %v242_v0 = vld [vmem:[%s201_s21] sm:$0xff]  ;;  %vm247_vm0 = vcmask 400384   ;;  %v243_v2 = vld [vmem:[%s201_s21 + $0x8] sm:$0xff]  ;;  %v628_v7 = vmov 0   ;;  %s231_s10 = scalar_lea.vmem [#allocation5], %s423_s18 }
  0x3b   : > { %v244_v1 = vld [vmem:[%s842_s1] sm:$0xff]  ;;  %501 = vset.pattern.permute.xlu1 %v628_v7  ;;  %502 = vset.pattern.permute.xlu0 %v628_v7  ;;  %s298_s22 = sshll.u32 %s231_s10, 4  ;;  %s433_s23 = sshll.u32 %s615_s15, 8  ;;  %s785_s22 = int_to_ptr.vmem [resolvable:$true] %s298_s22 }
  0x3c   : > { %v245_v3 = vmul.f32 %v244_v1, %v242_v0  ;;  %v246_v4 = vmul.f32 %v244_v1, %v243_v2  ;;  %v254_v8 = vld [vmem:[%s843_s2] sm:$0xff]  ;;  %s791_s30 = scalar_lea.hbm %s844_s3, %s433_s23  ;;  %s284_s4 = scalar_lea.sflag [#allocation4], %s764_s11 }
  0x3d   : > { %s541_s5 = scalar_lea.vmem %s785_s22, 256  ;;  %p852_p9 = scmp.ne.s32.totalorder %s848_s25, 0 }
  0x3e   : > { %v248_v5 = vsel %vm247_vm0, %v245_v3, 0.0  ;;  %v251_v6 = vsel %vm247_vm0, %v246_v4, 0.0  ;;  %p542_p8 = scmp.ne.s32.totalorder %s785_s22, %s541_s5  ;;  %s629_s15 = smov [#allocation5]  }
  0x3f   : > { %249 = vadd.xlane.f32.xlu0 %v248_v5  ;;  %s545_s7 = sshll.u32 %s629_s15, 4  ;;  %s546_s7 = int_to_ptr.vmem [resolvable:$false] %s545_s7 }
  0x40   : > { %p543_p11 = pnand %p542_p8, %p852_p9  ;;  %s547_s18 = scalar_lea.vmem %s546_s7, 512 }
  0x41   : > { %p548_p6 = scmp.lt.s32.totalorder %s785_s22, %s546_s7  ;;  %p549_p13 = scmp.lt.s32.totalorder %s547_s18, %s541_s5 }
  0x42   : > { %p544_p0 = pneg %p543_p11 }
  0x43   : > { %252 = vadd.xlane.f32.xlu0 %v251_v6  ;;  %p550_p2 = por %p549_p13, %p548_p6 }
  0x45   : > { %p551_p5 = pnand %p550_p2, %p544_p0 }
  0xcc   : > { %v250_v9 = vpop.xlane.xlu0 %249 }
  0xcd   : > { %v255_v10 = vadd.f32 %v254_v8, %v250_v9 }
  0xcf   : > { %v425_v11 = vmul.f32 -1.442695, %v255_v10 }
  0xd0   : > { %v253_v12 = vpop.xlane.xlu0 %252 }
  0xd1   : > { %503 = vpow2.f32 %v425_v11  ;;  %v256_v13 = vadd.f32 %v254_v8, %v253_v12 }
  0xd3   : > { %v426_v14 = vmul.f32 -1.442695, %v256_v13 }
  0xd5   : > { %505 = vpow2.f32 %v426_v14 }
  0xdb   : > { %v504_v15 = vpop.eup %503 }
  0xdc   : > { %v263_v16 = vadd.f32 1.0, %v504_v15 }
  0xde   : > { %507 = vrcp.f32 %v263_v16 }
  0xdf   : > { %v506_v17 = vpop.eup %505 }
  0xe0   : > { %v264_v18 = vadd.f32 1.0, %v506_v17 }
  0xe2   : > { %509 = vrcp.f32 %v264_v18 }
  0xe8   : > { %v508_v19 = vpop.eup %507 }
  0xe9   : > { %271 = vperm.xlu1 %501, %v508_v19  }
  0xec   : > { %v510_v20 = vpop.eup %509 }
  0xed   : > { %276 = vperm.xlu1 %501, %v510_v20  }
 0x168   : > { %v272_v21 = vpop.permute.xlu1 %271 }
 0x169   : > { %v279_v22 = vmul.f32 %v272_v21, %v242_v0 }
 0x16b   : > { %281 = vst.msk [vmem:[%s231_s10] sm:$0xff] %vm247_vm0, %v279_v22 }
 0x16c   : > { %v277_v23 = vpop.permute.xlu1 %276 }
 0x16d   : > { %v280_v24 = vmul.f32 %v277_v23, %v243_v2 }
 0x16f   : > { %282 = vst.msk [vmem:[%s231_s10 + $0x8] sm:$0xff] %vm247_vm0, %v280_v24 }
 0x170   : > { %554 = shalt.err (!%p551_p5)
}
 0x171   : > { %s555_s19 = scalar_lea.hbm %s791_s30, 256  ;;  %s559_s8 = scalar_lea.hbm %s844_s3, 512 }
 0x172   : > { %p556_p4 = scmp.ne.s32.totalorder %s791_s30, %s555_s19  ;;  %p560_p12 = scmp.lt.u32.totalorder %s791_s30, %s844_s3 }
 0x173   : > { %p561_p1 = scmp.lt.u32.totalorder %s559_s8, %s555_s19  ;;  %p563_p8 = scmp.lt.u32.totalorder %s555_s19, %s791_s30 }
 0x174   : > { %p557_p7 = pnand %p556_p4, %p852_p9 }
 0x175   : > { %p562_p3 = por %p561_p1, %p560_p12 }
 0x176   : > { %p558_p10 = pneg %p557_p7 }
 0x177   : > { %p564_p11 = por %p563_p8, %p562_p3 }
 0x179   : > { %p565_p0 = pnand %p564_p11, %p558_p10 }
 0x17b   : > { %568 = shalt.err (!%p565_p0)
}
 0x17c   : > { %s630_s10 = smov 128   ;;  %s631_s23 = smov 8  }
 0x17d   : > { %436 = dma.vmem_to_hbm [thread:$0]  (%p852_p9), %s785_s22, 256, %s791_s30, %s284_s4, %s630_s10, %s630_s10, %s631_s23  }
 0x17e PF: > { %s313_s28 = sand.u32 1, %s603_s12   ;;  %p853_p6 = scmp.ne.s32.totalorder %s849_s27, 0 }
 0x17f   : > { %p854_p13 = scmp.ge.s32.totalorder %s623_s17, 2  ;;  %s314_s29 = scalar_lea.sflag [#allocation4], %s313_s28 }
 0x181   : > { %p443_p2 = pnand %p854_p13, %p853_p6 }
 0x183   : > { %598 = dma.done.wait (!%p443_p2), %s314_s29, 256  }
 0x184   : > { %600 = vsyncadd (!%p443_p2), %s314_s29, 4294967040  ;;  %s19_s17 = sadd.s32 1, %s623_s17   ;;  %s855_s12 = smov %s607_s13 }
 0x185   : > { %p16_p5 = scmp.ge.s32.totalorder %s19_s17, 4   ;;  %s856_s13 = smov %s611_s14 }
 0x186   : > { %s857_s14 = smov %s708_s26  ;;  %s858_s15 = smov %s619_s16 }
 0x187   : > { %s859_s16 = smov %s861_s20  ;;  %18 = sbr.rel (!%p16_p5) target bundleno = 6 (0x6), region = 83 }
 0x18e   :  { %319 = vsyncpa [#allocation3], 1 }
 0x18f   :  { %321 = vsyncpa [#allocation3 + $0x1], 1 }
 0x190   :  { %322 = vsyncpa [#allocation4], 1 }
 0x191   :  { %324 = vsyncpa [#allocation4 + $0x1], 1 }

</bundles_post_ra>
